<compile_context>
chip_gen: v6e
topology: v6e:2x2x1
jax: 0.10.0
libtpu: 0.0.40
codegen_flags: <defaults>
</compile_context>

<pallas_src>
import functools

import numpy as np
import jax
import jax.numpy as jnp
from jax.experimental import pallas as pl
from jax.experimental.pallas import tpu as pltpu

D_PAD = 128      # lane-dense padding for every feature dimension (all dims <= 128)
NEG_BIG = -1e30  # masked-max fill (f32 only; do not move this epilogue to bf16)


# ----------------------------------------------------------------------------
# small helpers
# ----------------------------------------------------------------------------

def _round_up(n, m):
    return ((n + m - 1) // m) * m


def _vmem():
    return pl.BlockSpec(memory_space=pltpu.MemorySpace.VMEM)


def _pad2(a, rows, cols, dtype=jnp.float32):
    out = jnp.zeros((rows, cols), dtype)
    return out.at[:a.shape[0], :a.shape[1]].set(a.astype(dtype))


def _pad_row(v, cols=D_PAD):
    return jnp.zeros((1, cols), jnp.float32).at[0, :v.shape[0]].set(v)


# ----------------------------------------------------------------------------
# Pallas kernels
# ----------------------------------------------------------------------------

def _encode_kernel(a_ref, x_ref, *refs, num_blocks):
    """Fused encoder: `num_blocks` ResidualBlocks then row L2-normalisation.

    refs = [w_0, ws_0, vec_0, ..., w_{L-1}, ws_{L-1}, vec_{L-1}, out]
    vec rows: 0 = conv bias, 1 = BN scale (eval, folded), 2 = BN shift, 3 = shortcut bias.
    """
    o_ref = refs[-1]
    a = a_ref[...].astype(jnp.bfloat16)          # A_hat[dst, src] as bf16 MXU operand
    h = x_ref[...]
    for i in range(num_blocks):
        w_ref, ws_ref, vec_ref = refs[3 * i], refs[3 * i + 1], refs[3 * i + 2]
        hb = h.astype(jnp.bfloat16)
        t = jnp.dot(hb, w_ref[...], preferred_element_type=jnp.float32)              # X W
        t = jnp.dot(a, t.astype(jnp.bfloat16), preferred_element_type=jnp.float32)   # A_hat (X W)
        t = t + vec_ref[0:1, :]                                                      # conv bias
        t = t * vec_ref[1:2, :] + vec_ref[2:3, :]                                    # BN (eval) affine
        t = jnp.maximum(t, 0.0)
        res = jnp.dot(hb, ws_ref[...], preferred_element_type=jnp.float32) + vec_ref[3:4, :]
        h = jnp.maximum(t + res, 0.0)            # Dropout: identity in eval mode
    ssq = jnp.sum(h * h, axis=1, keepdims=True)
    o_ref[...] = h * jax.lax.rsqrt(jnp.maximum(ssq, 1e-24))   # F.normalize(p=2, dim=1)


def pallas_encode_batched(a_stack, x_stack, w_stacks, ws_stacks, vec_stacks):
    """Run the fused encoder for B independent (A_hat, X, weights) variants, grid=(B,)."""
    B, n_pad, _ = x_stack.shape
    L = len(w_stacks)
    in_specs = [pl.BlockSpec((None, n_pad, n_pad), lambda b: (b, 0, 0)),
                pl.BlockSpec((None, n_pad, D_PAD), lambda b: (b, 0, 0))]
    args = [a_stack, x_stack]
    for i in range(L):
        in_specs += [pl.BlockSpec((None, D_PAD, D_PAD), lambda b: (b, 0, 0)),
                     pl.BlockSpec((None, D_PAD, D_PAD), lambda b: (b, 0, 0)),
                     pl.BlockSpec((None, 8, D_PAD), lambda b: (b, 0, 0))]
        args += [w_stacks[i], ws_stacks[i], vec_stacks[i]]
    return pl.pallas_call(
        functools.partial(_encode_kernel, num_blocks=L),
        out_shape=jax.ShapeDtypeStruct((B, n_pad, D_PAD), jnp.float32),
        grid=(B,),
        in_specs=in_specs,
        out_specs=pl.BlockSpec((None, n_pad, D_PAD), lambda b: (b, 0, 0)),
        compiler_params=pltpu.CompilerParams(dimension_semantics=("parallel",)),
    )(*args)


def _bilinear_kernel(n_ref, z_ref, zt_ref, w_ref, o_ref, *, max_nodes):
    # BilinearEdgeDecoder: sigmoid(Z W Z^T), zero diagonal, zero outside the first
    # n rows/cols.  Z^T is passed in so no in-kernel transpose is needed.
    n = n_ref[pl.program_id(0)]
    zb = z_ref[...].astype(jnp.bfloat16)
    zw = jnp.dot(zb, w_ref[...], preferred_element_type=jnp.float32)
    s = jnp.dot(zw.astype(jnp.bfloat16), zt_ref[...].astype(jnp.bfloat16),
                preferred_element_type=jnp.float32)
    s = jax.nn.sigmoid(s)
    rows = jax.lax.broadcasted_iota(jnp.int32, (max_nodes, max_nodes), 0)
    cols = jax.lax.broadcasted_iota(jnp.int32, (max_nodes, max_nodes), 1)
    keep = (rows < n) & (cols < n) & (rows != cols)
    o_ref[...] = jnp.where(keep, s, 0.0)


def pallas_bilinear_edge(n_counts, z_stack, zt_stack, w_bf16, max_nodes):
    G = z_stack.shape[0]
    gs = pltpu.PrefetchScalarGridSpec(
        num_scalar_prefetch=1, grid=(G,),
        in_specs=[pl.BlockSpec((None, max_nodes, D_PAD), lambda g, n: (g, 0, 0)),
                  pl.BlockSpec((None, D_PAD, max_nodes), lambda g, n: (g, 0, 0)),
                  pl.BlockSpec((D_PAD, D_PAD), lambda g, n: (0, 0))],
        out_specs=pl.BlockSpec((None, max_nodes, max_nodes), lambda g, n: (g, 0, 0)))
    return pl.pallas_call(
        functools.partial(_bilinear_kernel, max_nodes=max_nodes),
        out_shape=jax.ShapeDtypeStruct((G, max_nodes, max_nodes), jnp.float32),
        grid_spec=gs,
        compiler_params=pltpu.CompilerParams(dimension_semantics=("parallel",)),
    )(n_counts, z_stack, zt_stack, w_bf16)


def _feat_dec_kernel(z_ref, *refs, n_hidden):
    # Feature_Decoder: (Linear -> ReLU -> BN(eval, folded affine)) x n_hidden -> Linear.
    o_ref = refs[-1]
    h = z_ref[...]
    idx = 0
    for _ in range(n_hidden):
        w_ref, b_ref, sc_ref, sh_ref = refs[idx], refs[idx + 1], refs[idx + 2], refs[idx + 3]
        idx += 4
        h = jnp.dot(h.astype(jnp.bfloat16), w_ref[...],
                    preferred_element_type=jnp.float32) + b_ref[...]
        h = jnp.maximum(h, 0.0)
        h = h * sc_ref[...] + sh_ref[...]
    w_ref, b_ref = refs[idx], refs[idx + 1]
    o_ref[...] = jnp.dot(h.astype(jnp.bfloat16), w_ref[...],
                         preferred_element_type=jnp.float32) + b_ref[...]


def _pool_kernel(mask_ref, mask_t_ref, z_ref, max_ref, mean_ref, *, g_pad):
    # global_max_pool + global_mean_pool for one [N_PAD, D_PAD] embedding slab.
    mask = mask_ref[...]                                     # [G_PAD, N_PAD] one-hot
    z = z_ref[...]                                           # [N_PAD, D_PAD]
    counts = jnp.sum(mask, axis=1, keepdims=True)
    mean_ref[...] = (jnp.dot(mask, z, preferred_element_type=jnp.float32)
                     / jnp.maximum(counts, 1.0))
    # Unrolled masked max with direct row stores (no concatenate, no transpose).
    for g in range(g_pad):
        colmask = mask_t_ref[:, g:g + 1]                     # [N_PAD, 1]
        mx = jnp.max(jnp.where(colmask > 0.0, z, NEG_BIG), axis=0, keepdims=True)
        max_ref[g:g + 1, :] = jnp.where(counts[g:g + 1, :] > 0.0, mx, 0.0)


def pallas_pool_batched(mask, mask_t, z_stack):
    B, n_pad, _ = z_stack.shape
    g_pad = mask.shape[0]
    return pl.pallas_call(
        functools.partial(_pool_kernel, g_pad=g_pad),
        out_shape=(jax.ShapeDtypeStruct((B, g_pad, D_PAD), jnp.float32),
                   jax.ShapeDtypeStruct((B, g_pad, D_PAD), jnp.float32)),
        grid=(B,),
        in_specs=[pl.BlockSpec((g_pad, n_pad), lambda b: (0, 0)),
                  pl.BlockSpec((n_pad, g_pad), lambda b: (0, 0)),
                  pl.BlockSpec((None, n_pad, D_PAD), lambda b: (b, 0, 0))],
        out_specs=(pl.BlockSpec((None, g_pad, D_PAD), lambda b: (b, 0, 0)),
                   pl.BlockSpec((None, g_pad, D_PAD), lambda b: (b, 0, 0))),
        compiler_params=pltpu.CompilerParams(dimension_semantics=("parallel",)),
    )(mask, mask_t, z_stack)


def _proj_kernel(x_ref, w0_ref, b0_ref, w1_ref, b1_ref, o_ref):
    # projection_head: Linear -> ReLU -> Linear (applied to z_g and z_prime_g rows).
    h = jnp.maximum(jnp.dot(x_ref[...].astype(jnp.bfloat16), w0_ref[...],
                            preferred_element_type=jnp.float32) + b0_ref[...], 0.0)
    o_ref[...] = jnp.dot(h.astype(jnp.bfloat16), w1_ref[...],
                         preferred_element_type=jnp.float32) + b1_ref[...]


def _encode_node_kernel(x_ref, *refs, n_layers, num_rows):
    # encode_node: (Linear+ReLU -> fresh training-mode BatchNorm1d) x (L-1)
    #              -> Linear+ReLU -> row normalize.
    o_ref = refs[-1]
    h = x_ref[...]
    for i in range(n_layers):
        w_ref, b_ref = refs[2 * i], refs[2 * i + 1]
        h = jnp.maximum(jnp.dot(h.astype(jnp.bfloat16), w_ref[...],
                                preferred_element_type=jnp.float32) + b_ref[...], 0.0)
        if i < n_layers - 1:
            # batch statistics over the `num_rows` real rows only (padding excluded)
            rows = jax.lax.broadcasted_iota(jnp.int32, h.shape, 0)
            rmask = (rows < num_rows).astype(jnp.float32)
            cnt = jnp.float32(num_rows)
            mean = jnp.sum(h * rmask, axis=0, keepdims=True) / cnt
            cen = (h - mean) * rmask
            var = jnp.sum(cen * cen, axis=0, keepdims=True) / cnt
            h = (h - mean) * jax.lax.rsqrt(var + 1e-5)
    ssq = jnp.sum(h * h, axis=1, keepdims=True)
    o_ref[...] = h * jax.lax.rsqrt(jnp.maximum(ssq, 1e-24))


# ----------------------------------------------------------------------------
# Parameter initialisation (deterministic, mirrors the PyTorch __init__ shapes)
# ----------------------------------------------------------------------------

def xavier(key, fan_in, fan_out, gain):
    a = gain * np.sqrt(6.0 / (fan_in + fan_out))
    return jax.random.uniform(key, (fan_in, fan_out), jnp.float32, -a, a)


def init_res_block(key, cin, cout):
    k1, k2 = jax.random.split(key)
    bn_scale = jnp.full((cout,), 1.0 / np.sqrt(1.0 + 1e-5), jnp.float32)
    ws = xavier(k2, cin, cout, gain=1.0) if cin != cout else jnp.eye(cout, dtype=jnp.float32)
    return {"w": xavier(k1, cin, cout, gain=np.sqrt(2.0)),   # GCNConv.lin.weight
            "b": jnp.zeros((cout,), jnp.float32),            # GCNConv.bias
            "bn_scale": bn_scale,                            # eval BN folded to affine
            "bn_shift": jnp.zeros((cout,), jnp.float32),
            "ws": ws,                                        # shortcut
            "bs": jnp.zeros((cout,), jnp.float32)}


def init_params(key, num_features, hidden_dims):
    keys = iter(jax.random.split(key, 32))
    params = {"enc": [], "sub": [], "node": []}
    cur = num_features
    for h in hidden_dims:
        params["enc"].append(init_res_block(next(keys), cur, h)); cur = h
    cur = num_features
    for h in hidden_dims:
        params["sub"].append(init_res_block(next(keys), cur, h)); cur = h
    cur = num_features
    for h in hidden_dims:
        params["node"].append({"w": xavier(next(keys), cur, h, gain=np.sqrt(2.0)),
                               "b": jnp.zeros((h,), jnp.float32)})
        cur = h
    d = hidden_dims[-1]
    params["edge_w"] = xavier(next(keys), d, d, gain=0.01)
    fd = []
    cur = d
    for h in reversed(hidden_dims[:-1]):
        fd.append({"w": xavier(next(keys), cur, h, gain=np.sqrt(2.0)),
                   "b": jnp.zeros((h,), jnp.float32),
                   "bn_scale": jnp.full((h,), 1.0 / np.sqrt(1.0 + 1e-5), jnp.float32),
                   "bn_shift": jnp.zeros((h,), jnp.float32)})
        cur = h
    params["feat_dec"] = fd
    params["feat_dec_last"] = {"w": xavier(next(keys), cur, num_features, gain=np.sqrt(2.0)),
                               "b": jnp.zeros((num_features,), jnp.float32)}
    params["proj"] = [{"w": xavier(next(keys), d, d, gain=np.sqrt(2.0)),
                       "b": jnp.zeros((d,), jnp.float32)} for _ in range(2)]
    return params


def _pad_res_blocks(blocks):
    """Zero-pad ResidualBlock params: bf16 weight slabs + packed f32 bias/BN rows."""
    padded = {"w": [], "ws": [], "vec": []}
    for p in blocks:
        padded["w"].append(_pad2(p["w"], D_PAD, D_PAD, jnp.bfloat16))
        padded["ws"].append(_pad2(p["ws"], D_PAD, D_PAD, jnp.bfloat16))
        vec = jnp.zeros((8, D_PAD), jnp.float32)
        for r, v in enumerate((p["b"], p["bn_scale"], p["bn_shift"], p["bs"])):
            vec = vec.at[r, :v.shape[0]].set(v)
        padded["vec"].append(vec)
    return padded


# ----------------------------------------------------------------------------
# Model forward (Pallas kernels + plain-JAX graph bookkeeping glue)
# ----------------------------------------------------------------------------

def gcn_norm(A):
    A1 = A + jnp.eye(A.shape[0], dtype=A.dtype)
    deg = jnp.sum(A1, axis=1)
    dinv = jax.lax.rsqrt(jnp.maximum(deg, 1e-12))
    return A1 * dinv[:, None] * dinv[None, :]


def forward(params, x, edge_index, batch, nodes_per_graph, max_nodes, key):
    N, F = x.shape
    G = len(nodes_per_graph)
    H2 = params["enc"][-1]["w"].shape[1]
    L = len(params["enc"])
    N_PAD = _round_up(N, 8)
    G_PAD = _round_up(G, 8)
    starts = [int(s) for s in np.cumsum([0] + list(nodes_per_graph[:-1]))]

    # Dense propagation matrix A[dst, src] (GCNConv aggregates src -> dst).
    A = jnp.zeros((N, N), jnp.float32).at[edge_index[1], edge_index[0]].set(1.0)
    a_hat_pad = _pad2(gcn_norm(A), N_PAD, N_PAD)
    # Edge-less graph: gcn_norm(0) == I, so the negative-subgraph pass uses the
    # identity propagation matrix directly (same result, no extra normalisation).
    eye_pad = _pad2(jnp.eye(N, dtype=jnp.float32), N_PAD, N_PAD)

    x_pad = _pad2(x, N_PAD, D_PAD)
    k1, k2 = jax.random.split(key)
    # conservative_augment_molecular_graph: node-attribute gaussian noise.
    # TODO(synk): edge masking (3% probability) is skipped to stay deterministic.
    aug_x_pad = x_pad.at[:N, :F].add(0.01 * jax.random.normal(k1, (N, F), jnp.float32))

    enc_pk = _pad_res_blocks(params["enc"])
    sub_pk = _pad_res_blocks(params["sub"])

    def stack_blocks(variant_pks):
        w_s, ws_s, vec_s = [], [], []
        for i in range(L):
            w_s.append(jnp.stack([pk["w"][i] for pk in variant_pks]))
            ws_s.append(jnp.stack([pk["ws"][i] for pk in variant_pks]))
            vec_s.append(jnp.stack([pk["vec"][i] for pk in variant_pks]))
        return w_s, ws_s, vec_s

    # Batched fused encode #1: [aug_x(enc), x(enc), pos_sub(sub), neg_sub(sub)].
    # TODO(synk): batch_nodes_subgraphs / process_subgraphs (dynamic k-hop subgraph
    # extraction) has no static-shape Pallas equivalent; pos subgraphs = the original
    # graphs, neg subgraphs = the same node sets with all edges removed.
    w_s, ws_s, vec_s = stack_blocks([enc_pk, enc_pk, sub_pk, sub_pk])
    a_stack = jnp.stack([a_hat_pad, a_hat_pad, a_hat_pad, eye_pad])
    x_stack = jnp.stack([aug_x_pad, x_pad, x_pad, x_pad])
    z_all = pallas_encode_batched(a_stack, x_stack, w_s, ws_s, vec_s)
    aug_z_pad, z_pad, pos_sub_z_pad, neg_sub_z_pad = z_all[0], z_all[1], z_all[2], z_all[3]

    # add_gaussian_perturbation  TODO(synk): std of original util unknown, using 0.1.
    z_prime_pad = z_pad.at[:N, :H2].add(0.1 * jax.random.normal(k2, (N, H2), jnp.float32))

    # adj_original: per-graph dense adjacency padded to max_nodes (glue).
    adj = jnp.zeros((G, max_nodes, max_nodes), jnp.float32)
    for i in range(G):
        s, n = starts[i], nodes_per_graph[i]
        adj = adj.at[i, :n, :n].set(A[s:s + n, s:s + n])

    # Per-graph bilinear edge decoding: one call, grid=(G,), scalar-prefetched counts.
    zg_pad = jnp.zeros((G, max_nodes, D_PAD), jnp.float32)
    for i in range(G):
        s, n = starts[i], nodes_per_graph[i]
        zg_pad = zg_pad.at[i, :n, :].set(z_pad[s:s + n, :])
    zg_pad_t = jnp.transpose(zg_pad, (0, 2, 1))
    edge_w_pad = _pad2(params["edge_w"], D_PAD, D_PAD, jnp.bfloat16)
    n_counts = jnp.asarray(nodes_per_graph, jnp.int32)
    adj_recon = pallas_bilinear_edge(n_counts, zg_pad, zg_pad_t, edge_w_pad, max_nodes)

    # get_edge_index_from_adj_list -> equivalent dense block-diagonal A[dst, src].
    A_new = jnp.zeros((N, N), jnp.float32)
    for i in range(G):
        s, n = starts[i], nodes_per_graph[i]
        blk = (adj_recon[i, :n, :n] > 0.5).astype(jnp.float32)
        A_new = A_new.at[s:s + n, s:s + n].set(blk.T)
    a_hat_new_pad = _pad2(gcn_norm(A_new), N_PAD, N_PAD)

    # Fused feature decoder.
    fd_args = []
    for p in params["feat_dec"]:
        fd_args += [_pad2(p["w"], D_PAD, D_PAD, jnp.bfloat16), _pad_row(p["b"]),
                    _pad_row(p["bn_scale"]), _pad_row(p["bn_shift"])]
    fd_args += [_pad2(params["feat_dec_last"]["w"], D_PAD, D_PAD, jnp.bfloat16),
                _pad_row(params["feat_dec_last"]["b"])]
    x_recon_pad = pl.pallas_call(
        functools.partial(_feat_dec_kernel, n_hidden=len(params["feat_dec"])),
        out_shape=jax.ShapeDtypeStruct((N_PAD, D_PAD), jnp.float32),
        in_specs=[_vmem()] * (1 + len(fd_args)),
        out_specs=_vmem(),
    )(z_pad, *fd_args)

    # Batched fused encode #2: z_tilde from x_recon and the reconstructed edges.
    w_s2, ws_s2, vec_s2 = stack_blocks([enc_pk])
    z_tilde_pad = pallas_encode_batched(a_hat_new_pad[None], x_recon_pad[None],
                                        w_s2, ws_s2, vec_s2)[0]

    # Batched pooling (max + mean) over all six node-embedding slabs.
    batch_padded = jnp.concatenate([batch.astype(jnp.int32),
                                    jnp.full((N_PAD - N,), -1, jnp.int32)])
    mask = (batch_padded[None, :] == jnp.arange(G_PAD, dtype=jnp.int32)[:, None]
            ).astype(jnp.float32)                                   # [G_PAD, N_PAD]
    mask_t = mask.T
    pool_stack = jnp.stack([aug_z_pad, z_pad, z_prime_pad, z_tilde_pad,
                            pos_sub_z_pad, neg_sub_z_pad])
    pooled_max, pooled_mean = pallas_pool_batched(mask, mask_t, pool_stack)
    aug_z_g = pooled_max[0, :G, :H2]          # global_max_pool
    z_g = pooled_max[1, :G, :H2]
    z_tilde_g = pooled_max[3, :G, :H2]
    pos_sub_z_g = pooled_mean[4, :G, :H2]     # global_mean_pool
    neg_sub_z_g = pooled_mean[5, :G, :H2]

    # Projection head on z_g and z_prime_g rows in a single fused call.
    proj_in = jnp.concatenate([pooled_max[1], pooled_max[2]], axis=0)   # [2*G_PAD, D_PAD]
    p0, p1 = params["proj"]
    proj_out = pl.pallas_call(
        _proj_kernel,
        out_shape=jax.ShapeDtypeStruct((2 * G_PAD, D_PAD), jnp.float32),
        in_specs=[_vmem()] * 5,
        out_specs=_vmem(),
    )(proj_in, _pad2(p0["w"], D_PAD, D_PAD, jnp.bfloat16), _pad_row(p0["b"]),
      _pad2(p1["w"], D_PAD, D_PAD, jnp.bfloat16), _pad_row(p1["b"]))
    z_g_mlp = proj_out[:G, :H2]
    z_prime_g_mlp = proj_out[G_PAD:G_PAD + G, :H2]

    # encode_node on the target node features.
    # TODO(synk): target node features = first node of each graph (deterministic
    # stand-in for batch_nodes_subgraphs' sampled target nodes).
    target_x = x[jnp.asarray(starts, jnp.int32), :]
    node_args = []
    for p in params["node"]:
        node_args += [_pad2(p["w"], D_PAD, D_PAD, jnp.bfloat16), _pad_row(p["b"])]
    target_z = pl.pallas_call(
        functools.partial(_encode_node_kernel, n_layers=len(params["node"]), num_rows=G),
        out_shape=jax.ShapeDtypeStruct((G_PAD, D_PAD), jnp.float32),
        in_specs=[_vmem()] * (1 + len(node_args)),
        out_specs=_vmem(),
    )(_pad2(target_x, G_PAD, D_PAD), *node_args)[:G, :H2]

    z = z_pad[:N, :H2]
    z_tilde = z_tilde_pad[:N, :H2]
    x_recon = x_recon_pad[:N, :F]
    return (adj, z, z_g, x_recon, adj_recon, z_tilde, z_tilde_g,
            pos_sub_z_g, neg_sub_z_g, z_g_mlp, z_prime_g_mlp, target_z, aug_z_g)


# ----------------------------------------------------------------------------
# Main
# ----------------------------------------------------------------------------

def ring_edges(n, offset):
    src, dst = [], []
    for i in range(n):
        j = (i + 1) % n
        src += [offset + i, offset + j]
        dst += [offset + j, offset + i]
    return src, dst


if __name__ == "__main__":
    num_features = 8
    hidden_dims = [16, 32]
    max_nodes = 16
    nodes_per_graph = [6, 5]
    N = sum(nodes_per_graph)

    key = jax.random.PRNGKey(0)
    k_param, k_x, k_noise = jax.random.split(key, 3)

    params = init_params(k_param, num_features, hidden_dims)
    x = jax.random.normal(k_x, (N, num_features), jnp.float32)

    src, dst = [], []
    off = 0
    for n in nodes_per_graph:
        s, d = ring_edges(n, off)
        src += s
        dst += d
        off += n
    edge_index = jnp.array([src, dst], jnp.int32)
    batch = jnp.array(sum(([g] * n for g, n in enumerate(nodes_per_graph)), []),
                      jnp.int32)

    outs = forward(params, x, edge_index, batch, nodes_per_graph, max_nodes, k_noise)
    jax.block_until_ready(outs)
    print("KERNEL_OK")
</pallas_src>

<mosaic_0001>
module attributes {stable_mosaic.version = 11 : i64} {
  func.func @_encode_kernel(%arg0: i32, %arg1: memref<1x16x16xf32, #tpu.memory_space<vmem>>, %arg2: memref<1x16x128xf32, #tpu.memory_space<vmem>>, %arg3: memref<1x128x128xbf16, #tpu.memory_space<vmem>>, %arg4: memref<1x128x128xbf16, #tpu.memory_space<vmem>>, %arg5: memref<1x8x128xf32, #tpu.memory_space<vmem>>, %arg6: memref<1x128x128xbf16, #tpu.memory_space<vmem>>, %arg7: memref<1x128x128xbf16, #tpu.memory_space<vmem>>, %arg8: memref<1x8x128xf32, #tpu.memory_space<vmem>>, %arg9: memref<1x16x128xf32, #tpu.memory_space<vmem>>) attributes {dimension_semantics = [#tpu.dimension_semantics<parallel>], iteration_bounds = array<i64: 4>, scalar_prefetch = 0 : i64, scratch_operands = 0 : i64, tpu.core_type = #tpu.core_type<tc>, window_params = [{transform_indices = @transform_0, window_bounds = array<i64: 1, 16, 16>}, {transform_indices = @transform_1, window_bounds = array<i64: 1, 16, 128>}, {transform_indices = @transform_2, window_bounds = array<i64: 1, 128, 128>}, {transform_indices = @transform_3, window_bounds = array<i64: 1, 128, 128>}, {transform_indices = @transform_4, window_bounds = array<i64: 1, 8, 128>}, {transform_indices = @transform_5, window_bounds = array<i64: 1, 128, 128>}, {transform_indices = @transform_6, window_bounds = array<i64: 1, 128, 128>}, {transform_indices = @transform_7, window_bounds = array<i64: 1, 8, 128>}, {transform_indices = @transform_8, window_bounds = array<i64: 1, 16, 128>}]} {
    %c0 = arith.constant 0 : index
    %c0_0 = arith.constant 0 : index
    %c0_1 = arith.constant 0 : index
    %0 = vector.load %arg1[%c0, %c0_0, %c0_1] : memref<1x16x16xf32, #tpu.memory_space<vmem>>, vector<1x16x16xf32>
    %1 = vector.shape_cast %0 : vector<1x16x16xf32> to vector<16x16xf32>
    %2 = arith.truncf %1 : vector<16x16xf32> to vector<16x16xbf16>
    %c0_2 = arith.constant 0 : index
    %c0_3 = arith.constant 0 : index
    %c0_4 = arith.constant 0 : index
    %3 = vector.load %arg2[%c0_2, %c0_3, %c0_4] : memref<1x16x128xf32, #tpu.memory_space<vmem>>, vector<1x16x128xf32>
    %4 = vector.shape_cast %3 : vector<1x16x128xf32> to vector<16x128xf32>
    %5 = arith.truncf %4 : vector<16x128xf32> to vector<16x128xbf16>
    %c0_5 = arith.constant 0 : index
    %c0_6 = arith.constant 0 : index
    %c0_7 = arith.constant 0 : index
    %6 = vector.load %arg3[%c0_5, %c0_6, %c0_7] : memref<1x128x128xbf16, #tpu.memory_space<vmem>>, vector<1x128x128xbf16>
    %7 = vector.shape_cast %6 : vector<1x128x128xbf16> to vector<128x128xbf16>
    %cst = arith.constant dense<0.000000e+00> : vector<16x128xf32>
    %8 = tpu.matmul %5, %7, %cst {dimension_numbers = #tpu.dot_dimension_numbers<[1], [0], [0], [1], [0, 0, 1, 1], [], []>} : vector<16x128xbf16>, vector<128x128xbf16>, vector<16x128xf32> -> vector<16x128xf32>
    %9 = arith.truncf %8 : vector<16x128xf32> to vector<16x128xbf16>
    %cst_8 = arith.constant dense<0.000000e+00> : vector<16x128xf32>
    %10 = tpu.matmul %2, %9, %cst_8 {dimension_numbers = #tpu.dot_dimension_numbers<[1], [0], [0], [1], [0, 0, 1, 1], [], []>} : vector<16x16xbf16>, vector<16x128xbf16>, vector<16x128xf32> -> vector<16x128xf32>
    %c0_9 = arith.constant 0 : index
    %c0_10 = arith.constant 0 : index
    %c0_11 = arith.constant 0 : index
    %11 = vector.load %arg5[%c0_9, %c0_10, %c0_11] : memref<1x8x128xf32, #tpu.memory_space<vmem>>, vector<1x1x128xf32>
    %12 = vector.shape_cast %11 : vector<1x1x128xf32> to vector<1x128xf32>
    %13 = vector.broadcast %12 : vector<1x128xf32> to vector<16x128xf32>
    %14 = arith.addf %10, %13 : vector<16x128xf32>
    %c0_12 = arith.constant 0 : index
    %c1 = arith.constant 1 : index
    %c0_13 = arith.constant 0 : index
    %15 = vector.load %arg5[%c0_12, %c1, %c0_13] : memref<1x8x128xf32, #tpu.memory_space<vmem>>, vector<1x1x128xf32>
    %16 = vector.shape_cast %15 : vector<1x1x128xf32> to vector<1x128xf32>
    %17 = vector.broadcast %16 : vector<1x128xf32> to vector<16x128xf32>
    %18 = arith.mulf %14, %17 : vector<16x128xf32>
    %c0_14 = arith.constant 0 : index
    %c2 = arith.constant 2 : index
    %c0_15 = arith.constant 0 : index
    %19 = vector.load %arg5[%c0_14, %c2, %c0_15] : memref<1x8x128xf32, #tpu.memory_space<vmem>>, vector<1x1x128xf32>
    %20 = vector.shape_cast %19 : vector<1x1x128xf32> to vector<1x128xf32>
    %21 = vector.broadcast %20 : vector<1x128xf32> to vector<16x128xf32>
    %22 = arith.addf %18, %21 : vector<16x128xf32>
    %cst_16 = arith.constant 0.000000e+00 : f32
    %23 = vector.broadcast %cst_16 : f32 to vector<16x128xf32>
    %24 = arith.maximumf %22, %23 : vector<16x128xf32>
    %c0_17 = arith.constant 0 : index
    %c0_18 = arith.constant 0 : index
    %c0_19 = arith.constant 0 : index
    %25 = vector.load %arg4[%c0_17, %c0_18, %c0_19] : memref<1x128x128xbf16, #tpu.memory_space<vmem>>, vector<1x128x128xbf16>
    %26 = vector.shape_cast %25 : vector<1x128x128xbf16> to vector<128x128xbf16>
    %cst_20 = arith.constant dense<0.000000e+00> : vector<16x128xf32>
    %27 = tpu.matmul %5, %26, %cst_20 {dimension_numbers = #tpu.dot_dimension_numbers<[1], [0], [0], [1], [0, 0, 1, 1], [], []>} : vector<16x128xbf16>, vector<128x128xbf16>, vector<16x128xf32> -> vector<16x128xf32>
    %c0_21 = arith.constant 0 : index
    %c3 = arith.constant 3 : index
    %c0_22 = arith.constant 0 : index
    %28 = vector.load %arg5[%c0_21, %c3, %c0_22] : memref<1x8x128xf32, #tpu.memory_space<vmem>>, vector<1x1x128xf32>
    %29 = vector.shape_cast %28 : vector<1x1x128xf32> to vector<1x128xf32>
    %30 = vector.broadcast %29 : vector<1x128xf32> to vector<16x128xf32>
    %31 = arith.addf %27, %30 : vector<16x128xf32>
    %32 = arith.addf %24, %31 : vector<16x128xf32>
    %cst_23 = arith.constant 0.000000e+00 : f32
    %33 = vector.broadcast %cst_23 : f32 to vector<16x128xf32>
    %34 = arith.maximumf %32, %33 : vector<16x128xf32>
    %35 = arith.truncf %34 : vector<16x128xf32> to vector<16x128xbf16>
    %c0_24 = arith.constant 0 : index
    %c0_25 = arith.constant 0 : index
    %c0_26 = arith.constant 0 : index
    %36 = vector.load %arg6[%c0_24, %c0_25, %c0_26] : memref<1x128x128xbf16, #tpu.memory_space<vmem>>, vector<1x128x128xbf16>
    %37 = vector.shape_cast %36 : vector<1x128x128xbf16> to vector<128x128xbf16>
    %cst_27 = arith.constant dense<0.000000e+00> : vector<16x128xf32>
    %38 = tpu.matmul %35, %37, %cst_27 {dimension_numbers = #tpu.dot_dimension_numbers<[1], [0], [0], [1], [0, 0, 1, 1], [], []>} : vector<16x128xbf16>, vector<128x128xbf16>, vector<16x128xf32> -> vector<16x128xf32>
    %39 = arith.truncf %38 : vector<16x128xf32> to vector<16x128xbf16>
    %cst_28 = arith.constant dense<0.000000e+00> : vector<16x128xf32>
    %40 = tpu.matmul %2, %39, %cst_28 {dimension_numbers = #tpu.dot_dimension_numbers<[1], [0], [0], [1], [0, 0, 1, 1], [], []>} : vector<16x16xbf16>, vector<16x128xbf16>, vector<16x128xf32> -> vector<16x128xf32>
    %c0_29 = arith.constant 0 : index
    %c0_30 = arith.constant 0 : index
    %c0_31 = arith.constant 0 : index
    %41 = vector.load %arg8[%c0_29, %c0_30, %c0_31] : memref<1x8x128xf32, #tpu.memory_space<vmem>>, vector<1x1x128xf32>
    %42 = vector.shape_cast %41 : vector<1x1x128xf32> to vector<1x128xf32>
    %43 = vector.broadcast %42 : vector<1x128xf32> to vector<16x128xf32>
    %44 = arith.addf %40, %43 : vector<16x128xf32>
    %c0_32 = arith.constant 0 : index
    %c1_33 = arith.constant 1 : index
    %c0_34 = arith.constant 0 : index
    %45 = vector.load %arg8[%c0_32, %c1_33, %c0_34] : memref<1x8x128xf32, #tpu.memory_space<vmem>>, vector<1x1x128xf32>
    %46 = vector.shape_cast %45 : vector<1x1x128xf32> to vector<1x128xf32>
    %47 = vector.broadcast %46 : vector<1x128xf32> to vector<16x128xf32>
    %48 = arith.mulf %44, %47 : vector<16x128xf32>
    %c0_35 = arith.constant 0 : index
    %c2_36 = arith.constant 2 : index
    %c0_37 = arith.constant 0 : index
    %49 = vector.load %arg8[%c0_35, %c2_36, %c0_37] : memref<1x8x128xf32, #tpu.memory_space<vmem>>, vector<1x1x128xf32>
    %50 = vector.shape_cast %49 : vector<1x1x128xf32> to vector<1x128xf32>
    %51 = vector.broadcast %50 : vector<1x128xf32> to vector<16x128xf32>
    %52 = arith.addf %48, %51 : vector<16x128xf32>
    %cst_38 = arith.constant 0.000000e+00 : f32
    %53 = vector.broadcast %cst_38 : f32 to vector<16x128xf32>
    %54 = arith.maximumf %52, %53 : vector<16x128xf32>
    %c0_39 = arith.constant 0 : index
    %c0_40 = arith.constant 0 : index
    %c0_41 = arith.constant 0 : index
    %55 = vector.load %arg7[%c0_39, %c0_40, %c0_41] : memref<1x128x128xbf16, #tpu.memory_space<vmem>>, vector<1x128x128xbf16>
    %56 = vector.shape_cast %55 : vector<1x128x128xbf16> to vector<128x128xbf16>
    %cst_42 = arith.constant dense<0.000000e+00> : vector<16x128xf32>
    %57 = tpu.matmul %35, %56, %cst_42 {dimension_numbers = #tpu.dot_dimension_numbers<[1], [0], [0], [1], [0, 0, 1, 1], [], []>} : vector<16x128xbf16>, vector<128x128xbf16>, vector<16x128xf32> -> vector<16x128xf32>
    %c0_43 = arith.constant 0 : index
    %c3_44 = arith.constant 3 : index
    %c0_45 = arith.constant 0 : index
    %58 = vector.load %arg8[%c0_43, %c3_44, %c0_45] : memref<1x8x128xf32, #tpu.memory_space<vmem>>, vector<1x1x128xf32>
    %59 = vector.shape_cast %58 : vector<1x1x128xf32> to vector<1x128xf32>
    %60 = vector.broadcast %59 : vector<1x128xf32> to vector<16x128xf32>
    %61 = arith.addf %57, %60 : vector<16x128xf32>
    %62 = arith.addf %54, %61 : vector<16x128xf32>
    %cst_46 = arith.constant 0.000000e+00 : f32
    %63 = vector.broadcast %cst_46 : f32 to vector<16x128xf32>
    %64 = arith.maximumf %62, %63 : vector<16x128xf32>
    %65 = arith.mulf %64, %64 : vector<16x128xf32>
    %cst_47 = arith.constant dense<0.000000e+00> : vector<16xf32>
    %66 = vector.multi_reduction <add>, %65, %cst_47 [1] : vector<16x128xf32> to vector<16xf32>
    %67 = vector.shape_cast %66 : vector<16xf32> to vector<16x1xf32>
    %cst_48 = arith.constant 1.000000e-24 : f32
    %68 = vector.broadcast %cst_48 : f32 to vector<16x1xf32>
    %69 = arith.maximumf %67, %68 : vector<16x1xf32>
    %70 = math.rsqrt %69 : vector<16x1xf32>
    %71 = vector.broadcast %70 : vector<16x1xf32> to vector<16x128xf32>
    %72 = arith.mulf %64, %71 : vector<16x128xf32>
    %c0_49 = arith.constant 0 : index
    %c0_50 = arith.constant 0 : index
    %c0_51 = arith.constant 0 : index
    %73 = vector.load %arg9[%c0_49, %c0_50, %c0_51] : memref<1x16x128xf32, #tpu.memory_space<vmem>>, vector<1x16x128xf32>
    %74 = vector.shape_cast %73 : vector<1x16x128xf32> to vector<16x128xf32>
    %75 = vector.shape_cast %72 : vector<16x128xf32> to vector<1x16x128xf32>
    tpu.vector_store %arg9[%c0_49, %c0_50, %c0_51], %75 {strides = array<i32>} : memref<1x16x128xf32, #tpu.memory_space<vmem>>, vector<1x16x128xf32>,
    return
  }
  func.func @transform_0(%arg0: i32) -> (i32, i32, i32) {
    %c0_i32 = arith.constant 0 : i32
    %c0_i32_0 = arith.constant 0 : i32
    %c0_i32_1 = arith.constant 0 : i32
    return %arg0, %c0_i32, %c0_i32_0 : i32, i32, i32
  }
  func.func @transform_1(%arg0: i32) -> (i32, i32, i32) {
    %c0_i32 = arith.constant 0 : i32
    %c0_i32_0 = arith.constant 0 : i32
    %c0_i32_1 = arith.constant 0 : i32
    return %arg0, %c0_i32, %c0_i32_0 : i32, i32, i32
  }
  func.func @transform_2(%arg0: i32) -> (i32, i32, i32) {
    %c0_i32 = arith.constant 0 : i32
    %c0_i32_0 = arith.constant 0 : i32
    %c0_i32_1 = arith.constant 0 : i32
    return %arg0, %c0_i32, %c0_i32_0 : i32, i32, i32
  }
  func.func @transform_3(%arg0: i32) -> (i32, i32, i32) {
    %c0_i32 = arith.constant 0 : i32
    %c0_i32_0 = arith.constant 0 : i32
    %c0_i32_1 = arith.constant 0 : i32
    return %arg0, %c0_i32, %c0_i32_0 : i32, i32, i32
  }
  func.func @transform_4(%arg0: i32) -> (i32, i32, i32) {
    %c0_i32 = arith.constant 0 : i32
    %c0_i32_0 = arith.constant 0 : i32
    %c0_i32_1 = arith.constant 0 : i32
    return %arg0, %c0_i32, %c0_i32_0 : i32, i32, i32
  }
  func.func @transform_5(%arg0: i32) -> (i32, i32, i32) {
    %c0_i32 = arith.constant 0 : i32
    %c0_i32_0 = arith.constant 0 : i32
    %c0_i32_1 = arith.constant 0 : i32
    return %arg0, %c0_i32, %c0_i32_0 : i32, i32, i32
  }
  func.func @transform_6(%arg0: i32) -> (i32, i32, i32) {
    %c0_i32 = arith.constant 0 : i32
    %c0_i32_0 = arith.constant 0 : i32
    %c0_i32_1 = arith.constant 0 : i32
    return %arg0, %c0_i32, %c0_i32_0 : i32, i32, i32
  }
  func.func @transform_7(%arg0: i32) -> (i32, i32, i32) {
    %c0_i32 = arith.constant 0 : i32
    %c0_i32_0 = arith.constant 0 : i32
    %c0_i32_1 = arith.constant 0 : i32
    return %arg0, %c0_i32, %c0_i32_0 : i32, i32, i32
  }
  func.func @transform_8(%arg0: i32) -> (i32, i32, i32) {
    %c0_i32 = arith.constant 0 : i32
    %c0_i32_0 = arith.constant 0 : i32
    %c0_i32_1 = arith.constant 0 : i32
    return %arg0, %c0_i32, %c0_i32_0 : i32, i32, i32
  }
}

</mosaic_0001>

<bundles_post_ra>
// kernel: tpu_custom_call.1
= control target key start
LH: loop header
LB: loop body
LE: loop exit
PB: predicated region body
PF: predicated region fallthrough
CT: control target
= control target key end

     0   :  { %s2666_s0 = inlined_call_operand.hbm [shape: f32[4,16,16], index: 0, kind: input, shape index: {}]   ;;  %s2667_s1 = inlined_call_operand.hbm [shape: f32[4,16,128], index: 1, kind: input, shape index: {}]   ;;  %s2668_s2 = inlined_call_operand.hbm [shape: bf16[4,128,128], index: 2, kind: input, shape index: {}]   ;;  %s2669_s3 = inlined_call_operand.hbm [shape: bf16[4,128,128], index: 3, kind: input, shape index: {}]   ;;  %s2670_s4 = inlined_call_operand.hbm [shape: f32[4,8,128], index: 4, kind: input, shape index: {}]   ;;  %s2671_s5 = inlined_call_operand.hbm [shape: bf16[4,128,128], index: 5, kind: input, shape index: {}]   ;;  %s2672_s6 = inlined_call_operand.hbm [shape: bf16[4,128,128], index: 6, kind: input, shape index: {}]   ;;  %s2673_s7 = inlined_call_operand.hbm [shape: f32[4,8,128], index: 7, kind: input, shape index: {}]   ;;  %s2674_s8 = inlined_call_operand.hbm [shape: f32[4,16,128], index: 8, kind: output, shape index: {}]  }
   0x1   :  { %2690 = sst [smem:[#allocation28_spill]] %s2666_s0 }
   0x2   :  { %2691 = sst [smem:[#allocation29_spill]] %s2667_s1 }
   0x3   :  { %2692 = sst [smem:[#allocation30_spill]] %s2668_s2 }
   0x4   :  { %2693 = sst [smem:[#allocation31_spill]] %s2669_s3 }
   0x5   :  { %2694 = sst [smem:[#allocation32_spill]] %s2671_s5 }
   0x6   :  { %2695 = sst [smem:[#allocation33_spill]] %s2674_s8 }
   0x7   :  { %13 = vsyncpa [#allocation3], 0 }
   0x8   :  { %15 = vsyncpa [#allocation3 + $0x1], 0 }
   0x9   :  { %16 = vsyncpa [#allocation6], 0 }
   0xa   :  { %18 = vsyncpa [#allocation6 + $0x1], 0 }
   0xb   :  { %19 = vsyncpa [#allocation9], 0 }
   0xc   :  { %21 = vsyncpa [#allocation9 + $0x1], 0 }
   0xd   :  { %22 = vsyncpa [#allocation12], 0 }
   0xe   :  { %24 = vsyncpa [#allocation12 + $0x1], 0 }
   0xf   :  { %25 = vsyncpa [#allocation15], 0 }
  0x10   :  { %27 = vsyncpa [#allocation15 + $0x1], 0 }
  0x11   :  { %28 = vsyncpa [#allocation4], 0 }
  0x12   :  { %30 = vsyncpa [#allocation4 + $0x1], 0  ;;  %s2132_s27 = smov 0   ;;  %s2134_s28 = smov 0  }
  0x13   :  { %s2136_s29 = smov 0   ;;  %s2138_s30 = smov 0  }
  0x14 LB: > { %2696 = sst [smem:[#allocation23_spill]] %s2056_s27  ;;  %s2153_s9 = sadd.s32 4294967295, %s2068_s30   ;;  %s2068_s30 = sphi %s2138_s30, %s2730_s30   ;;  %s2064_s29 = sphi %s2136_s29, %s2732_s29   ;;  %s2060_s28 = sphi %s2134_s28, %s2734_s28   ;;  %s2056_s27 = sphi %s2132_s27, %s2733_s27  }
  0x15   : > { %2697 = sst [smem:[#allocation24_spill]] %s2064_s29  ;;  %s1418_s10 = sadd.s32 4294967294, %s2068_s30  }
  0x16   : > { %s2157_s11 = sadd.s32 1, %s2068_s30   ;;  %s43_s12 = sadd.s32 1, %s2064_s29 }
  0x17   : > { %2698 = sst [smem:[#allocation25_spill]] %s2157_s11  ;;  %s40_s13 = ssub.s32 %s2068_s30, %s2157_s11 }
  0x18   : > { %p50_p0 = scmp.ne.s32.totalorder %s2064_s29, %s2060_s28  ;;  %p41_p1 = scmp.eq.s32.totalorder %s40_s13, 0 }
  0x19   : > { %p51_p2 = scmp.eq.s32.totalorder %s2068_s30, 0  ;;  %p56_p3 = scmp.ne.s32.totalorder %s2060_s28, %s2056_s27 }
  0x1a   : > { %p57_p4 = scmp.eq.s32.totalorder %s2153_s9, 0  ;;  %p262_p7 = scmp.eq.s32.totalorder %s2153_s9, 3 }
  0x1b   : > { %s2169_s14 = scalar_select %p41_p1, %s2064_s29, %s43_s12  }
  0x1c   : > { %p52_p5 = por %p51_p2, %p50_p0  ;;  %p2171_p6 = por %p57_p4, %p56_p3 }
  0x1d   : > { %2699 = sst [smem:[#allocation26_spill]] %s2169_s14  ;;  %p268_p8 = scmp.eq.s32.totalorder %s1418_s10, 3 }
  0x1e   : > { %s2700_s15 = scalar_select %p2171_p6, 1, 0 }
  0x1f   : > { %p1686_p9 = scmp.lt.s32.totalorder %s2068_s30, 4  ;;  %p2177_p10 = por %p262_p7, %p50_p0 }
  0x20   : > { %p2181_p11 = por %p268_p8, %p56_p3  ;;  %s2186_s18 = sand.u32 1, %s2064_s29  }
  0x21   : > { %s2701_s16 = scalar_select %p2177_p10, 1, 0 }
  0x22   : > { %s2702_s17 = scalar_select %p2181_p11, 1, 0 }
  0x23   : > { %s2676_s19 = sshll.u32 %s2068_s30, 8  ;;  %s2675_s20 = sshll.u32 %s2186_s18, 4 }
  0x24   : > { %2703 = sst [smem:[#allocation27_spill]] %s2702_s17  ;;  %p2190_p12 = pnand %p1686_p9, %p52_p5 }
  0x25   : > { %s2195_s22 = sand.u32 1, %s2068_s30   ;;  %s2705_s1 = sld [smem:[#allocation29_spill]] }
  0x26   : > { %s313_s26 = scalar_lea.vmem [#allocation5], %s2675_s20  ;;  %p2214_p1 = pneg %p2190_p12 }
  0x27   : > { %s320_s10 = sshll.u32 %s313_s26, 4  ;;  %s2206_s10 = int_to_ptr.vmem [resolvable:$true] %s320_s10 }
  0x2b   : > { %s2202_s25 = scalar_lea.hbm %s2705_s1, %s2676_s19  ;;  %s1769_s20 = scalar_lea.hbm %s2705_s1, 1024 }
  0x2c   : > { %s1764_s13 = scalar_lea.hbm %s2202_s25, 256  ;;  %p1770_p4 = scmp.lt.s32.totalorder %s2202_s25, %s2705_s1 }
  0x2d   : > { %p1765_p0 = scmp.ne.s32.totalorder %s2202_s25, %s1764_s13  ;;  %p1771_p5 = scmp.lt.s32.totalorder %s1769_s20, %s1764_s13 }
  0x2f   : > { %p1767_p2 = pnand %p2214_p1, %p1765_p0  ;;  %p1772_p7 = por %p1771_p5, %p1770_p4 }
  0x31   : > { %p1768_p3 = pneg %p1767_p2 }
  0x33   : > { %p1773_p8 = pnand %p1772_p7, %p1768_p3 }
  0x35   : > { %1776 = shalt.err (!%p1773_p8)
}
  0x36   : > { %s1777_s12 = scalar_lea.vmem %s2206_s10, 256  ;;  %s2070_s29 = smov [#allocation5]  }
  0x37   : > { %p1778_p9 = scmp.ne.s32.totalorder %s2206_s10, %s1777_s12  ;;  %s1782_s23 = sshll.u32 %s2070_s29, 4  ;;  %s1783_s23 = int_to_ptr.vmem [resolvable:$false] %s1782_s23 }
  0x38   : > { %s1784_s24 = scalar_lea.vmem %s1783_s23, 512  ;;  %p1785_p13 = scmp.lt.s32.totalorder %s2206_s10, %s1783_s23 }
  0x39   : > { %p1780_p0 = pnand %p1778_p9, %p2214_p1  ;;  %p1786_p11 = scmp.lt.s32.totalorder %s1784_s24, %s1777_s12 }
  0x3b   : > { %p1781_p2 = pneg %p1780_p0  ;;  %p1787_p10 = por %p1786_p11, %p1785_p13 }
  0x3d   : > { %p1788_p6 = pnand %p1787_p10, %p1781_p2 }
  0x3f   : > { %1791 = shalt.err (!%p1788_p6)
}
  0x40   : > { %s2680_s19 = smov 128   ;;  %s2681_s20 = smov 8  }
  0x41   : > { %s2707_s29 = scalar_lea.sflag [#allocation6], %s2195_s22  ;;  %p448_p10 = scmp.lt.s32.totalorder %s2068_s30, 5 }
  0x42   : > { %1663 = dma.hbm_to_vmem [thread:$0]  (!%p2190_p12), %s2202_s25, 256, %s2206_s10, %s2707_s29, %s2680_s19, %s2680_s19, %s2681_s20  }
  0x43   : > { %s2243_s12 = sshll.u32 %s2186_s18, 6  ;;  %s2246_s13 = sshll.u32 %s2068_s30, 10 }
  0x44   : > { %p2708_p6 = scmp.ge.s32.totalorder %s2068_s30, 1  ;;  %s2710_s3 = sld [smem:[#allocation31_spill]] }
  0x45   : > { %s355_s25 = scalar_lea.vmem [#allocation8], %s2243_s12 }
  0x46   : > { %p2250_p11 = pnand %p2708_p6, %p448_p10  ;;  %s362_s10 = sshll.u32 %s355_s25, 4  ;;  %s2261_s10 = int_to_ptr.vmem [resolvable:$true] %s362_s10 }
  0x48   : > { %s2709_s26 = scalar_select %p2250_p11, 1, 0 }
  0x4a   : > { %s2258_s1 = scalar_lea.hbm %s2710_s3, %s2246_s13  ;;  %s1797_s17 = scalar_lea.hbm %s2710_s3, 4096 }
  0x4b   : > { %s1792_s19 = scalar_lea.hbm %s2258_s1, 1024  ;;  %p1798_p5 = scmp.lt.s32.totalorder %s2258_s1, %s2710_s3 }
  0x4c   : > { %p1793_p13 = scmp.ne.s32.totalorder %s2258_s1, %s1792_s19  ;;  %p1799_p7 = scmp.lt.s32.totalorder %s1797_s17, %s1792_s19 }
  0x4e   : > { %p1795_p3 = pnand %p1793_p13, %p2214_p1  ;;  %p1800_p8 = por %p1799_p7, %p1798_p5 }
  0x50   : > { %p1796_p4 = pneg %p1795_p3 }
  0x52   : > { %p1801_p9 = pnand %p1800_p8, %p1796_p4 }
  0x54   : > { %1804 = shalt.err (!%p1801_p9)
}
  0x55   : > { %s1805_s25 = scalar_lea.vmem %s2261_s10, 1024  ;;  %s2073_s29 = smov [#allocation8]  }
  0x56   : > { %p1806_p0 = scmp.ne.s32.totalorder %s2261_s10, %s1805_s25  ;;  %s1810_s11 = sshll.u32 %s2073_s29, 4  ;;  %s1811_s11 = int_to_ptr.vmem [resolvable:$false] %s1810_s11 }
  0x57   : > { %s1812_s20 = scalar_lea.vmem %s1811_s11, 2048  ;;  %p1813_p6 = scmp.lt.s32.totalorder %s2261_s10, %s1811_s11 }
  0x58   : > { %p1808_p2 = pnand %p1806_p0, %p2214_p1  ;;  %p1814_p13 = scmp.lt.s32.totalorder %s1812_s20, %s1805_s25 }
  0x5a   : > { %p1809_p10 = pneg %p1808_p2  ;;  %p1815_p3 = por %p1814_p13, %p1813_p6 }
  0x5c   : > { %p1816_p11 = pnand %p1815_p3, %p1809_p10 }
  0x5e   : > { %1819 = shalt.err (!%p1816_p11)
}
  0x5f   : > { %s2688_s17 = smov 64   ;;  %s2075_s19 = smov 4  }
  0x60   : > { %s2711_s29 = scalar_lea.sflag [#allocation9], %s2195_s22  ;;  %s2712_s5 = sld [smem:[#allocation32_spill]] }
  0x61   : > { %1669 = dma.hbm_to_vmem [thread:$0]  (!%p2190_p12), %s2258_s1, 1024, %s2261_s10, %s2711_s29, %s2688_s17, %s2688_s17, %s2075_s19  }
  0x62   : > { %s394_s11 = scalar_lea.vmem [#allocation11], %s2243_s12  ;;  %s2687_s3 = scalar_lea.sflag [#allocation12], %s2195_s22 }
  0x63   : > { %s401_s20 = sshll.u32 %s394_s11, 4  ;;  %s2296_s20 = int_to_ptr.vmem [resolvable:$true] %s401_s20 }
  0x66   : > { %s2293_s25 = scalar_lea.hbm %s2712_s5, %s2246_s13  ;;  %s1825_s10 = scalar_lea.hbm %s2712_s5, 4096 }
  0x67   : > { %s1820_s27 = scalar_lea.hbm %s2293_s25, 1024  ;;  %p1826_p7 = scmp.lt.s32.totalorder %s2293_s25, %s2712_s5 }
  0x68   : > { %p1821_p11 = scmp.ne.s32.totalorder %s2293_s25, %s1820_s27  ;;  %p1827_p8 = scmp.lt.s32.totalorder %s1825_s10, %s1820_s27 }
  0x6a   : > { %p1823_p4 = pnand %p1821_p11, %p2214_p1  ;;  %p1828_p9 = por %p1827_p8, %p1826_p7 }
  0x6c   : > { %p1824_p5 = pneg %p1823_p4 }
  0x6e   : > { %p1829_p0 = pnand %p1828_p9, %p1824_p5 }
  0x70   : > { %1832 = shalt.err (!%p1829_p0)
}
  0x71   : > { %s1833_s24 = scalar_lea.vmem %s2296_s20, 1024  ;;  %s2076_s11 = smov [#allocation11]  }
  0x72   : > { %p1834_p2 = scmp.ne.s32.totalorder %s2296_s20, %s1833_s24  ;;  %s1838_s8 = sshll.u32 %s2076_s11, 4  ;;  %s1839_s8 = int_to_ptr.vmem [resolvable:$false] %s1838_s8 }
  0x73   : > { %s1840_s1 = scalar_lea.vmem %s1839_s8, 2048  ;;  %p1841_p13 = scmp.lt.s32.totalorder %s2296_s20, %s1839_s8 }
  0x74   : > { %p1836_p10 = pnand %p1834_p2, %p2214_p1  ;;  %p1842_p3 = scmp.lt.s32.totalorder %s1840_s1, %s1833_s24 }
  0x76   : > { %p1837_p6 = pneg %p1836_p10  ;;  %p1843_p11 = por %p1842_p3, %p1841_p13 }
  0x78   : > { %p1844_p4 = pnand %p1843_p11, %p1837_p6 }
  0x7a   : > { %1847 = shalt.err (!%p1844_p4)
}
  0x7b   : > { %1675 = dma.hbm_to_vmem [thread:$0]  (!%p2190_p12), %s2293_s25, 1024, %s2296_s20, %s2687_s3, %s2688_s17, %s2688_s17, %s2075_s19  }
  0x7c   : > { %s2713_s27 = sshll.u32 %s2068_s30, 8  ;;  %s2714_s0 = sld [smem:[#allocation28_spill]] }
  0x7d   : > { %s2715_s24 = sshll.u32 %s2186_s18, 4  ;;  %s289_s1 = scalar_lea.sflag [#allocation3], %s2186_s18 }
  0x7e   : > { %s292_s11 = scalar_lea.vmem [#allocation2], %s2715_s24 }
  0x7f   : > { %s299_s8 = sshll.u32 %s292_s11, 4  ;;  %s2333_s8 = int_to_ptr.vmem [resolvable:$true] %s299_s8 }
  0x82   : > { %s2329_s23 = scalar_lea.hbm %s2714_s0, %s2713_s27  ;;  %s1853_s10 = scalar_lea.hbm %s2714_s0, 1024 }
  0x83   : > { %s1848_s5 = scalar_lea.hbm %s2329_s23, 256  ;;  %p1854_p9 = scmp.lt.s32.totalorder %s2329_s23, %s2714_s0 }
  0x84   : > { %p1849_p5 = scmp.ne.s32.totalorder %s2329_s23, %s1848_s5  ;;  %p1855_p0 = scmp.lt.s32.totalorder %s1853_s10, %s1848_s5 }
  0x86   : > { %p1851_p7 = pnand %p1849_p5, %p2214_p1  ;;  %p1856_p2 = por %p1855_p0, %p1854_p9 }
  0x88   : > { %p1852_p8 = pneg %p1851_p7 }
  0x8a   : > { %p1857_p10 = pnand %p1856_p2, %p1852_p8 }
  0x8c   : > { %1860 = shalt.err (!%p1857_p10)
}
  0x8d   : > { %s1861_s24 = scalar_lea.vmem %s2333_s8, 256  ;;  %s2077_s11 = smov [#allocation2]  }
  0x8e   : > { %p1862_p6 = scmp.ne.s32.totalorder %s2333_s8, %s1861_s24  ;;  %s1866_s25 = sshll.u32 %s2077_s11, 4  ;;  %s1867_s25 = int_to_ptr.vmem [resolvable:$false] %s1866_s25 }
  0x8f   : > { %s1868_s20 = scalar_lea.vmem %s1867_s25, 512  ;;  %p1869_p11 = scmp.lt.s32.totalorder %s2333_s8, %s1867_s25 }
  0x90   : > { %p1864_p13 = pnand %p1862_p6, %p2214_p1  ;;  %p1870_p4 = scmp.lt.s32.totalorder %s1868_s20, %s1861_s24 }
  0x92   : > { %p1865_p3 = pneg %p1864_p13  ;;  %p1871_p5 = por %p1870_p4, %p1869_p11 }
  0x94   : > { %p1872_p7 = pnand %p1871_p5, %p1865_p3 }
  0x96   : > { %1875 = shalt.err (!%p1872_p7)
}
  0x97   : > { %s2716_s5 = smov 8   ;;  %s2717_s10 = smov 128  }
  0x98   : > { %1660 = dma.hbm_to_vmem [thread:$0]  (!%p2190_p12), %s2329_s23, 256, %s2333_s8, %s289_s1, %s2717_s10, %s2717_s10, %s2716_s5  }
  0x99   : > { %s2718_s2 = sld [smem:[#allocation30_spill]]  ;;  %s334_s24 = scalar_lea.vmem [#allocation7], %s2243_s12 }
  0x9a   : > { %s341_s25 = sshll.u32 %s334_s24, 4  ;;  %s1433_s20 = sshll.u32 %s2186_s18, 3  ;;  %s2366_s25 = int_to_ptr.vmem [resolvable:$true] %s341_s25 }
  0x9f   : > { %s2363_s11 = scalar_lea.hbm %s2718_s2, %s2246_s13  ;;  %s1881_s8 = scalar_lea.hbm %s2718_s2, 4096 }
  0xa0   : > { %s1876_s3 = scalar_lea.hbm %s2363_s11, 1024  ;;  %p1882_p2 = scmp.lt.s32.totalorder %s2363_s11, %s2718_s2 }
  0xa1   : > { %p1877_p8 = scmp.ne.s32.totalorder %s2363_s11, %s1876_s3  ;;  %p1883_p10 = scmp.lt.s32.totalorder %s1881_s8, %s1876_s3 }
  0xa3   : > { %p1879_p9 = pnand %p1877_p8, %p2214_p1  ;;  %p1884_p6 = por %p1883_p10, %p1882_p2 }
  0xa5   : > { %p1880_p0 = pneg %p1879_p9 }
  0xa7   : > { %p1885_p13 = pnand %p1884_p6, %p1880_p0 }
  0xa9   : > { %1888 = shalt.err (!%p1885_p13)
}
  0xaa   : > { %s1889_s10 = scalar_lea.vmem %s2366_s25, 1024  ;;  %s2078_s27 = smov [#allocation7]  }
  0xab   : > { %p1890_p3 = scmp.ne.s32.totalorder %s2366_s25, %s1889_s10  ;;  %s1894_s17 = sshll.u32 %s2078_s27, 4  ;;  %s1895_s17 = int_to_ptr.vmem [resolvable:$false] %s1894_s17 }
  0xac   : > { %s1896_s29 = scalar_lea.vmem %s1895_s17, 2048  ;;  %p1897_p5 = scmp.lt.s32.totalorder %s2366_s25, %s1895_s17 }
  0xad   : > { %p1892_p11 = pnand %p1890_p3, %p2214_p1  ;;  %p1898_p7 = scmp.lt.s32.totalorder %s1896_s29, %s1889_s10 }
  0xaf   : > { %p1893_p4 = pneg %p1892_p11  ;;  %p1899_p8 = por %p1898_p7, %p1897_p5 }
  0xb1   : > { %p1900_p9 = pnand %p1899_p8, %p1893_p4 }
  0xb3   : > { %1903 = shalt.err (!%p1900_p9)
}
  0xb4   : > { %s2719_s3 = smov 64   ;;  %s2720_s24 = scalar_lea.sflag [#allocation6], %s2195_s22 }
  0xb5   : > { %1666 = dma.hbm_to_vmem [thread:$0]  (!%p2190_p12), %s2363_s11, 1024, %s2366_s25, %s2720_s24, %s2719_s3, %s2719_s3, %s2075_s19  }
  0xb6   : > { %s1434_s23 = sshll.u32 %s2068_s30, 7  ;;  %s376_s10 = scalar_lea.vmem [#allocation10], %s1433_s20 }
  0xb7   : > { %s381_s5 = scalar_lea.hbm %s2670_s4, %s1434_s23  ;;  %s383_s27 = sshll.u32 %s376_s10, 4  ;;  %s384_s27 = int_to_ptr.vmem [resolvable:$true] %s383_s27 }
  0xb8   : > { %s1904_s17 = scalar_lea.hbm %s381_s5, 128  ;;  %s1909_s2 = scalar_lea.hbm %s2670_s4, 512 }
  0xb9   : > { %p1905_p0 = scmp.ne.s32.totalorder %s381_s5, %s1904_s17  ;;  %p1910_p6 = scmp.lt.s32.totalorder %s381_s5, %s2670_s4 }
  0xba   : > { %p1911_p13 = scmp.lt.s32.totalorder %s1909_s2, %s1904_s17 }
  0xbb   : > { %p1907_p2 = pnand %p1905_p0, %p2214_p1 }
  0xbc   : > { %p1912_p3 = por %p1911_p13, %p1910_p6 }
  0xbd   : > { %p1908_p10 = pneg %p1907_p2 }
  0xbf   : > { %p1913_p11 = pnand %p1912_p3, %p1908_p10 }
  0xc1   : > { %1916 = shalt.err (!%p1913_p11)
}
  0xc2   : > { %s1917_s24 = scalar_lea.vmem %s384_s27, 128  ;;  %s2079_s8 = smov [#allocation10]  }
  0xc3   : > { %p1918_p4 = scmp.ne.s32.totalorder %s384_s27, %s1917_s24  ;;  %s1922_s1 = sshll.u32 %s2079_s8, 4  ;;  %s1923_s1 = int_to_ptr.vmem [resolvable:$false] %s1922_s1 }
  0xc4   : > { %s1924_s10 = scalar_lea.vmem %s1923_s1, 256  ;;  %p1925_p8 = scmp.lt.s32.totalorder %s384_s27, %s1923_s1 }
  0xc5   : > { %p1920_p5 = pnand %p1918_p4, %p2214_p1  ;;  %p1926_p9 = scmp.lt.s32.totalorder %s1924_s10, %s1917_s24 }
  0xc7   : > { %p1921_p7 = pneg %p1920_p5  ;;  %p1927_p0 = por %p1926_p9, %p1925_p8 }
  0xc9   : > { %p1928_p2 = pnand %p1927_p0, %p1921_p7 }
  0xcb   : > { %1931 = shalt.err (!%p1928_p2)
}
  0xcc   : > { %s2721_s0 = scalar_lea.sflag [#allocation9], %s2195_s22  ;;  %s2420_s29 = scalar_lea.hbm %s2672_s6, %s2246_s13 }
  0xcd   : > { %1672 = dma.hbm_to_vmem [thread:$0]  (!%p2190_p12), %s381_s5, 128, %s384_s27, %s2721_s0  }
  0xce   : > { %s415_s11 = scalar_lea.vmem [#allocation13], %s2243_s12  ;;  %s1932_s24 = scalar_lea.hbm %s2420_s29, 1024 }
  0xcf   : > { %s422_s25 = sshll.u32 %s415_s11, 4  ;;  %p1933_p10 = scmp.ne.s32.totalorder %s2420_s29, %s1932_s24  ;;  %s423_s25 = int_to_ptr.vmem [resolvable:$true] %s422_s25 }
  0xd0   : > { %s1937_s5 = scalar_lea.hbm %s2672_s6, 4096  ;;  %p1938_p3 = scmp.lt.s32.totalorder %s2420_s29, %s2672_s6 }
  0xd1   : > { %p1935_p6 = pnand %p1933_p10, %p2214_p1  ;;  %p1939_p11 = scmp.lt.s32.totalorder %s1937_s5, %s1932_s24 }
  0xd3   : > { %p1936_p13 = pneg %p1935_p6  ;;  %p1940_p4 = por %p1939_p11, %p1938_p3 }
  0xd5   : > { %p1941_p5 = pnand %p1940_p4, %p1936_p13 }
  0xd7   : > { %1944 = shalt.err (!%p1941_p5)
}
  0xd8   : > { %s1945_s12 = scalar_lea.vmem %s423_s25, 1024  ;;  %s2080_s13 = smov [#allocation13]  }
  0xd9   : > { %p1946_p7 = scmp.ne.s32.totalorder %s423_s25, %s1945_s12  ;;  %s1950_s0 = sshll.u32 %s2080_s13, 4  ;;  %s1951_s0 = int_to_ptr.vmem [resolvable:$false] %s1950_s0 }
  0xda   : > { %s1952_s2 = scalar_lea.vmem %s1951_s0, 2048  ;;  %p1953_p0 = scmp.lt.s32.totalorder %s423_s25, %s1951_s0 }
  0xdb   : > { %p1948_p8 = pnand %p1946_p7, %p2214_p1  ;;  %p1954_p2 = scmp.lt.s32.totalorder %s1952_s2, %s1945_s12 }
  0xdd   : > { %p1949_p9 = pneg %p1948_p8  ;;  %p1955_p10 = por %p1954_p2, %p1953_p0 }
  0xdf   : > { %p1956_p6 = pnand %p1955_p10, %p1949_p9 }
  0xe1   : > { %1959 = shalt.err (!%p1956_p6)
}
  0xe2   : > { %s2722_s17 = scalar_lea.sflag [#allocation12], %s2195_s22  ;;  %s2449_s8 = scalar_lea.hbm %s2673_s7, %s1434_s23 }
  0xe3   : > { %1678 = dma.hbm_to_vmem [thread:$0]  (!%p2190_p12), %s2420_s29, 1024, %s423_s25, %s2722_s17, %s2719_s3, %s2719_s3, %s2075_s19  }
  0xe4   : > { %s436_s1 = scalar_lea.vmem [#allocation14], %s1433_s20  ;;  %s433_s22 = scalar_lea.sflag [#allocation15], %s2186_s18 }
  0xe5   : > { %s443_s5 = sshll.u32 %s436_s1, 4  ;;  %s1960_s27 = scalar_lea.hbm %s2449_s8, 128  ;;  %s444_s5 = int_to_ptr.vmem [resolvable:$true] %s443_s5 }
  0xe6   : > { %p1961_p13 = scmp.ne.s32.totalorder %s2449_s8, %s1960_s27  ;;  %s1965_s29 = scalar_lea.hbm %s2673_s7, 512 }
  0xe7   : > { %p1966_p4 = scmp.lt.s32.totalorder %s2449_s8, %s2673_s7  ;;  %p1967_p5 = scmp.lt.s32.totalorder %s1965_s29, %s1960_s27 }
  0xe8   : > { %p1963_p3 = pnand %p1961_p13, %p2214_p1 }
  0xe9   : > { %p1968_p7 = por %p1967_p5, %p1966_p4 }
  0xea   : > { %p1964_p11 = pneg %p1963_p3 }
  0xec   : > { %p1969_p8 = pnand %p1968_p7, %p1964_p11 }
  0xee   : > { %1972 = shalt.err (!%p1969_p8)
}
  0xef   : > { %s1973_s20 = scalar_lea.vmem %s444_s5, 128  ;;  %s2081_s18 = smov [#allocation14]  }
  0xf0   : > { %p1974_p9 = scmp.ne.s32.totalorder %s444_s5, %s1973_s20  ;;  %s1978_s10 = sshll.u32 %s2081_s18, 4  ;;  %s1979_s10 = int_to_ptr.vmem [resolvable:$false] %s1978_s10 }
  0xf1   : > { %s1980_s12 = scalar_lea.vmem %s1979_s10, 256  ;;  %p1981_p10 = scmp.lt.s32.totalorder %s444_s5, %s1979_s10 }
  0xf2   : > { %p1976_p0 = pnand %p1974_p9, %p2214_p1  ;;  %p1982_p6 = scmp.lt.s32.totalorder %s1980_s12, %s1973_s20 }
  0xf4   : > { %p1977_p2 = pneg %p1976_p0  ;;  %p1983_p13 = por %p1982_p6, %p1981_p10 }
  0xf6   : > { %p1984_p3 = pnand %p1983_p13, %p1977_p2 }
  0xf8   : > { %1987 = shalt.err (!%p1984_p3)
}
  0xf9   : > { %1681 = dma.hbm_to_vmem [thread:$0]  (!%p2190_p12), %s2449_s8, 128, %s444_s5, %s433_s22  }
  0xfa   : > { %p2723_p11 = scmp.ne.s32.totalorder %s2709_s26, 0 }
  0xfb   : > { %s2473_s14 = sand.u32 (!%p2723_p11), 1, %s2060_s28   ;;  %p2724_p1 = scmp.ne.s32.totalorder (!%p2723_p11), %s2700_s15, 0 }
  0xfc   : > { %452 = sbr.rel (%p2723_p11) target bundleno = 1326 (0x52e), region = 52  ;;  %s2476_s13 = sshll.u32 (!%p2723_p11), %s2473_s14, 4 }
  0xfd   : > { %s455_s0 = scalar_lea.sflag (!%p2723_p11), [#allocation3], %s2473_s14  ;;  %s458_s2 = scalar_lea.vmem (!%p2723_p11), [#allocation2], %s2476_s13 }
 0x101   : > { %2031 = dma.done.wait (%p2724_p1), %s455_s0, 256  }
 0x102   : > { %2033 = vsyncadd (%p2724_p1), %s455_s0, 4294967040  ;;  %s463_s21 = sand.u32 1, %s2153_s9   ;;  %s467_s17 = scalar_lea.vmem [#allocation5], %s2476_s13 }
 0x103   : > { %s464_s26 = scalar_lea.sflag [#allocation6], %s463_s21 }
 0x104   : > { %2035 = dma.done.wait (%p2724_p1), %s464_s26, 1280  }
 0x105   : > { %2037 = vsyncadd (%p2724_p1), %s464_s26, 4294966016  ;;  %s1446_s11 = sshll.u32 %s2473_s14, 6  ;;  %s482_s8 = scalar_lea.sflag [#allocation9], %s463_s21 }
 0x106   : > { %s2491_s24 = scalar_lea.vmem [#allocation7], %s1446_s11  ;;  %s2493_s1 = scalar_lea.vmem [#allocation8], %s1446_s11 }
 0x107   : > { %2039 = dma.done.wait (%p2724_p1), %s482_s8, 1152  }
 0x108   : > { %2041 = vsyncadd (%p2724_p1), %s482_s8, 4294966144  ;;  %s1448_s5 = sshll.u32 %s2473_s14, 3  ;;  %s500_s27 = scalar_lea.sflag [#allocation12], %s463_s21 }
 0x109   : > { %s2500_s22 = scalar_lea.vmem [#allocation10], %s1448_s5  ;;  %s2502_s19 = scalar_lea.vmem [#allocation11], %s1446_s11 }
 0x10a   : > { %2043 = dma.done.wait (%p2724_p1), %s500_s27, 2048  }
 0x10b   : > { %2045 = vsyncadd (%p2724_p1), %s500_s27, 4294965248  ;;  %s2508_s3 = scalar_lea.vmem [#allocation13], %s1446_s11  ;;  %s518_s29 = scalar_lea.sflag [#allocation15], %s2473_s14 }
 0x10c   : > { %s2511_s25 = scalar_lea.vmem [#allocation14], %s1448_s5 }
 0x10d   : > { %2047 = dma.done.wait (%p2724_p1), %s518_s29, 128  }
 0x10e   : > { %2049 = vsyncadd (%p2724_p1), %s518_s29, 4294967168  ;;  %v2082_v0 = vmov 0.0   ;;  %vm2083_vm0 = vmmov 0   ;;  %v1728_v1 = vld [vmem:[%s2491_s24 + $0x38] sm:$0xff]   ;;  %v1729_v2 = vld [vmem:[%s2491_s24 + $0x30] sm:$0xff]   ;;  %vm707_vm1 = vcmask 130048  }
 0x10f   : > { %1547 = vmatprep.subr.bf16.mxu0 %v2082_v0  ;;  %1563 = vmatprep.mubr.msk.bf16.mxu0 %vm2083_vm0, %v2082_v0  ;;  %v1730_v3 = vld [vmem:[%s2491_s24 + $0x28] sm:$0xff]   ;;  %v1736_v4 = vld [vmem:[%s2493_s1 + $0x38] sm:$0xff]   ;;  %v1731_v5 = vld [vmem:[%s2491_s24 + $0x20] sm:$0xff]   ;;  %s1506_s15 = sshll.u32 %s2153_s9, 8  ;;  %s588_s23 = scalar_lea.vmem [#allocation16], %s2476_s13 }
 0x110   : > { %1573 = vmatprep.subr.bf16.mxu1 %v2082_v0  ;;  %1589 = vmatprep.mubr.msk.bf16.mxu1 %vm2083_vm0, %v2082_v0  ;;  %v1737_v6 = vld [vmem:[%s2493_s1 + $0x30] sm:$0xff]   ;;  %v1732_v7 = vld [vmem:[%s2491_s24 + $0x18] sm:$0xff]   ;;  %v1738_v8 = vld [vmem:[%s2493_s1 + $0x28] sm:$0xff]   ;;  %s1193_s20 = sshll.u32 %s588_s23, 4  ;;  %s2725_s12 = sld [smem:[#allocation33_spill]]  ;;  %s2624_s20 = int_to_ptr.vmem [resolvable:$true] %s1193_s20 }
 0x111   : > { %1548 = vmatpush3.bf16.msra.mxu0 %v1728_v1  ;;  %1574 = vmatpush3.bf16.msra.mxu1 %v1736_v4  ;;  %v1733_v9 = vld [vmem:[%s2491_s24 + $0x10] sm:$0xff]   ;;  %v1739_v10 = vld [vmem:[%s2493_s1 + $0x20] sm:$0xff]   ;;  %v1734_v11 = vld [vmem:[%s2491_s24 + $0x8] sm:$0xff]   ;;  %s1988_s21 = scalar_lea.vmem %s2624_s20, 256  ;;  %p2726_p4 = scmp.ne.s32.totalorder %s2701_s16, 0 }
 0x112   : > { %1549 = vmatprep.subr.bf16.mxu0 %v2082_v0  ;;  %1575 = vmatprep.subr.bf16.mxu1 %v2082_v0  ;;  %v1740_v12 = vld [vmem:[%s2493_s1 + $0x18] sm:$0xff]   ;;  %v1735_v13 = vld [vmem:[%s2491_s24] sm:$0xff]   ;;  %v1741_v17 = vld [vmem:[%s2493_s1 + $0x10] sm:$0xff]   ;;  %p1989_p12 = scmp.ne.s32.totalorder %s2624_s20, %s1988_s21  ;;  %s2084_s9 = smov [#allocation16]  }
 0x113   : > { %v593_v14 = vld [vmem:[%s467_s17] sm:$0xff]  ;;  %v594_v15 = vld [vmem:[%s467_s17 + $0x8] sm:$0xff]  ;;  %s1992_s13 = sshll.u32 %s2084_s9, 4  ;;  %s1993_s13 = int_to_ptr.vmem [resolvable:$false] %s1992_s13 }
 0x114   : > { %v595_v16 = vpack.c.bf16 %v594_v15, %v593_v14  ;;  %v1742_v18 = vld [vmem:[%s2493_s1 + $0x8] sm:$0xff]   ;;  %v1743_v19 = vld [vmem:[%s2493_s1] sm:$0xff]   ;;  %v1746_v30 = vld [vmem:[%s2502_s19 + $0x28] sm:$0xff]   ;;  %p1990_p5 = pnand %p1989_p12, %p2726_p4  ;;  %s1994_s26 = scalar_lea.vmem %s1993_s13, 512 }
 0x115   : > { %1550 = vmatpush3.bf16.msra.mxu0 %v1729_v2  ;;  %1576 = vmatpush3.bf16.msra.mxu1 %v1737_v6  ;;  %v590_v22 = vld [vmem:[%s458_s2] sm:$0xff]  ;;  %v591_v23 = vld [vmem:[%s458_s2 + $0x8] sm:$0xff]  ;;  %s1180_s2 = scalar_lea.sflag [#allocation4], %s2473_s14  ;;  %p1995_p8 = scmp.lt.s32.totalorder %s2624_s20, %s1993_s13 }
 0x116   : > { %1551 = vmatprep.subr.bf16.mxu0 %v2082_v0  ;;  %1577 = vmatprep.subr.bf16.mxu1 %v2082_v0  ;;  %v2567_v27 = vpack.c.bf16 %v591_v23, %v590_v22  ;;  %v1744_v28 = vld [vmem:[%s2502_s19 + $0x38] sm:$0xff]   ;;  %v1745_v29 = vld [vmem:[%s2502_s19 + $0x30] sm:$0xff]   ;;  %v1747_v31 = vld [vmem:[%s2502_s19 + $0x20] sm:$0xff]   ;;  %s2622_s0 = scalar_lea.hbm %s2725_s12, %s1506_s15  ;;  %p1991_p7 = pneg %p1990_p5 }
 0x117   : > { %v1748_v34 = vld [vmem:[%s2502_s19 + $0x18] sm:$0xff]   ;;  %v1749_v37 = vld [vmem:[%s2502_s19 + $0x10] sm:$0xff]   ;;  %v1750_v38 = vld [vmem:[%s2502_s19 + $0x8] sm:$0xff]   ;;  %p1996_p9 = scmp.lt.s32.totalorder %s1994_s26, %s1988_s21 }
 0x118   : > { %v1751_v39 = vld [vmem:[%s2502_s19] sm:$0xff]   ;;  %v1461_v40 = vld [vmem:[%s2500_s22] ss:$0 sm:$0xff]  ;;  %v1463_v42 = vld [vmem:[%s2500_s22 + $0x1] ss:$0 sm:$0xff] }
 0x119   : > { %1552 = vmatpush3.bf16.msra.mxu0 %v1730_v3  ;;  %1578 = vmatpush3.bf16.msra.mxu1 %v1738_v8  ;;  %v1464_v44 = vld [vmem:[%s2500_s22 + $0x2] ss:$0 sm:$0xff]  ;;  %v1465_v47 = vld [vmem:[%s2500_s22 + $0x3] ss:$0 sm:$0xff]  ;;  %v1755_v8 = vld [vmem:[%s2508_s3 + $0x20] sm:$0xff]   ;;  %p1997_p0 = por %p1996_p9, %p1995_p8 }
 0x11a   : > { %1553 = vmatprep.subr.bf16.mxu0 %v2082_v0  ;;  %1579 = vmatprep.subr.bf16.mxu1 %v2082_v0  ;;  %v1753_v6 = vld [vmem:[%s2508_s3 + $0x30] sm:$0xff]   ;;  %v1485_v22 = vld [vmem:[%s2511_s25 + $0x2] ss:$0 sm:$0xff] }
 0x11b   : > { %p1998_p2 = pnand %p1997_p0, %p1991_p7 }
 0x11d   : > { %1554 = vmatpush3.bf16.msra.mxu0 %v1731_v5  ;;  %1580 = vmatpush3.bf16.msra.mxu1 %v1739_v10  ;;  %v1752_v5 = vld [vmem:[%s2508_s3 + $0x38] sm:$0xff]   ;;  %v1757_v10 = vld [vmem:[%s2508_s3 + $0x10] sm:$0xff]  }
 0x11e   : > { %1555 = vmatprep.subr.bf16.mxu0 %v2082_v0  ;;  %1581 = vmatprep.subr.bf16.mxu1 %v2082_v0 }
 0x121   : > { %1556 = vmatpush3.bf16.msra.mxu0 %v1732_v7  ;;  %1582 = vmatpush3.bf16.msra.mxu1 %v1740_v12  ;;  %v1754_v7 = vld [vmem:[%s2508_s3 + $0x28] sm:$0xff]   ;;  %v1759_v12 = vld [vmem:[%s2508_s3] sm:$0xff]  }
 0x122   : > { %1557 = vmatprep.subr.bf16.mxu0 %v2082_v0  ;;  %1583 = vmatprep.subr.bf16.mxu1 %v2082_v0 }
 0x125   : > { %1558 = vmatpush3.bf16.msra.mxu0 %v1733_v9  ;;  %1584 = vmatpush3.bf16.msra.mxu1 %v1741_v17  ;;  %v1756_v9 = vld [vmem:[%s2508_s3 + $0x18] sm:$0xff]   ;;  %v1482_v17 = vld [vmem:[%s2511_s25] ss:$0 sm:$0xff] }
 0x126   : > { %1559 = vmatprep.subr.bf16.mxu0 %v2082_v0  ;;  %1585 = vmatprep.subr.bf16.mxu1 %v2082_v0 }
 0x129   : > { %1560 = vmatpush3.bf16.msra.mxu0 %v1734_v11  ;;  %1586 = vmatpush3.bf16.msra.mxu1 %v1742_v18  ;;  %v1758_v11 = vld [vmem:[%s2508_s3 + $0x8] sm:$0xff]  }
 0x12a   : > { %1561 = vmatprep.subr.bf16.mxu0 %v2082_v0  ;;  %1587 = vmatprep.subr.bf16.mxu1 %v2082_v0 }
 0x12d   : > { %1562 = vmatpush3.bf16.msra.mxu0 %v1735_v13  ;;  %1588 = vmatpush3.bf16.msra.mxu1 %v1743_v19  ;;  %v1484_v19 = vld [vmem:[%s2511_s25 + $0x1] ss:$0 sm:$0xff] }
 0x12e   : > { %1567 = vmatprep.subr.bf16.mxu0 %v2082_v0  ;;  %1613 = vmatprep.subr.bf16.mxu1 %v2082_v0 }
 0x130   : > { %1564 = vmatmul.mubr.bf16.vlgmr.msra.gmra.mxu0 %v595_v16  ;;  %1590 = vmatmul.mubr.bf16.vlgmr.msra.gmra.mxu1 %v595_v16 }
 0x131   : > { %1569 = vmatprep.mubr.msk.bf16.mxu0 %vm2083_vm0, %v2082_v0  ;;  %1615 = vmatprep.mubr.msk.bf16.mxu1 %vm2083_vm0, %v2082_v0 }
 0x1f0   : > { %v694_v20 = vpop.f32.mrf.mxu0  ;;  %v871_v32 = vpop.f32.mrf.mxu1 }
 0x1f1   : > { %v872_v53 = vadd.f32 %v1465_v47, %v871_v32 }
 0x1f2   : > { %v1565_v21 = vpop.f32.mrf.mxu0  ;;  %v1591_v33 = vpop.f32.mrf.mxu1 }
 0x1f4   : > { %v697_v24 = vpop.f32.mrf.mxu0  ;;  %v874_v35 = vpop.f32.mrf.mxu1 }
 0x1f5   : > { %v701_v25 = vpack.c.bf16 %v697_v24, %v694_v20  ;;  %v875_v58 = vadd.f32 %v1465_v47, %v874_v35 }
 0x1f6   : > { %v1566_v26 = vpop.f32.mrf.mxu0  ;;  %v1592_v36 = vpop.f32.mrf.mxu1 }
 0x1f7   : > { %1568 = vmatpush3.bf16.msra.mxu0 %v701_v25  ;;  %v1486_v25 = vld [vmem:[%s2511_s25 + $0x3] ss:$0 sm:$0xff] }
 0x1f8   : > { %1593 = vmatprep.subr.bf16.mxu0 %v2082_v0 }
 0x1fa   : > { %1570 = vmatmul.mubr.msk.bf16.vlgmr.msra.gmra.mxu0 %vm707_vm1, %v2567_v27 }
 0x1fb   : > { %1594 = vmatpush3.bf16.msra.mxu0 %v1744_v28  ;;  %1609 = vmatprep.mubr.msk.bf16.mxu0 %vm2083_vm0, %v2082_v0 }
 0x1fc   : > { %1595 = vmatprep.subr.bf16.mxu0 %v2082_v0 }
 0x1ff   : > { %1596 = vmatpush3.bf16.msra.mxu0 %v1745_v29 }
 0x200   : > { %1597 = vmatprep.subr.bf16.mxu0 %v2082_v0 }
 0x203   : > { %1598 = vmatpush3.bf16.msra.mxu0 %v1746_v30 }
 0x204   : > { %1599 = vmatprep.subr.bf16.mxu0 %v2082_v0 }
 0x207   : > { %1600 = vmatpush3.bf16.msra.mxu0 %v1747_v31 }
 0x208   : > { %1601 = vmatprep.subr.bf16.mxu0 %v2082_v0 }
 0x20b   : > { %1602 = vmatpush3.bf16.msra.mxu0 %v1748_v34 }
 0x20c   : > { %1603 = vmatprep.subr.bf16.mxu0 %v2082_v0 }
 0x20f   : > { %1604 = vmatpush3.bf16.msra.mxu0 %v1749_v37 }
 0x210   : > { %1605 = vmatprep.subr.bf16.mxu0 %v2082_v0 }
 0x213   : > { %1606 = vmatpush3.bf16.msra.mxu0 %v1750_v38 }
 0x214   : > { %1607 = vmatprep.subr.bf16.mxu0 %v2082_v0 }
 0x217   : > { %1608 = vmatpush3.bf16.msra.mxu0 %v1751_v39 }
 0x2ba   : > { %v745_v41 = vpop.f32.mrf.mxu0 }
 0x2bb   : > { %v746_v43 = vadd.f32 %v1461_v40, %v745_v41 }
 0x2bc   : > { %v1571_v45 = vpop.f32.mrf.mxu0 }
 0x2bd   : > { %v757_v46 = vmul.f32 %v1463_v42, %v746_v43 }
 0x2be   : > { %v748_v48 = vpop.f32.mrf.mxu0 }
 0x2bf   : > { %v764_v49 = vadd.f32 %v1464_v44, %v757_v46  ;;  %v749_v50 = vadd.f32 %v1461_v40, %v748_v48 }
 0x2c0   : > { %v1572_v51 = vpop.f32.mrf.mxu0 }
 0x2c1   : > { %v766_v52 = vmax.f32 %v764_v49, 0.0  ;;  %v758_v54 = vmul.f32 %v1463_v42, %v749_v50 }
 0x2c3   : > { %v765_v55 = vadd.f32 %v1464_v44, %v758_v54  ;;  %v878_v56 = vadd.f32 %v872_v53, %v766_v52 }
 0x2c5   : > { %v767_v57 = vmax.f32 %v765_v55, 0.0  ;;  %v880_v60 = vmax.f32 %v878_v56, 0.0 }
 0x2c7   : > { %v879_v59 = vadd.f32 %v875_v58, %v767_v57 }
 0x2c9   : > { %v881_v61 = vmax.f32 %v879_v59, 0.0 }
 0x2cb   : > { %v882_v62 = vpack.c.bf16 %v881_v61, %v880_v60 }
 0x2cd   : > { %1610 = vmatmul.mubr.bf16.vlgmr.msra.gmra.mxu0 %v882_v62 }
 0x38d   : > { %v981_v63 = vpop.f32.mrf.mxu0 }
 0x38f   : > { %v1611_v1 = vpop.f32.mrf.mxu0 }
 0x391   : > { %v984_v2 = vpop.f32.mrf.mxu0 }
 0x392   : > { %v988_v3 = vpack.c.bf16 %v984_v2, %v981_v63 }
 0x393   : > { %v1612_v4 = vpop.f32.mrf.mxu0 }
 0x394   : > { %1614 = vmatpush3.bf16.msra.mxu1 %v988_v3 }
 0x395   : > { %1619 = vmatprep.subr.bf16.mxu1 %v2082_v0 }
 0x397   : > { %1616 = vmatmul.mubr.msk.bf16.vlgmr.msra.gmra.mxu1 %vm707_vm1, %v2567_v27 }
 0x398   : > { %1620 = vmatpush3.bf16.msra.mxu1 %v1752_v5  ;;  %1635 = vmatprep.mubr.msk.bf16.mxu1 %vm2083_vm0, %v2082_v0 }
 0x399   : > { %1621 = vmatprep.subr.bf16.mxu1 %v2082_v0 }
 0x39c   : > { %1622 = vmatpush3.bf16.msra.mxu1 %v1753_v6 }
 0x39d   : > { %1623 = vmatprep.subr.bf16.mxu1 %v2082_v0 }
 0x3a0   : > { %1624 = vmatpush3.bf16.msra.mxu1 %v1754_v7 }
 0x3a1   : > { %1625 = vmatprep.subr.bf16.mxu1 %v2082_v0 }
 0x3a4   : > { %1626 = vmatpush3.bf16.msra.mxu1 %v1755_v8 }
 0x3a5   : > { %1627 = vmatprep.subr.bf16.mxu1 %v2082_v0 }
 0x3a8   : > { %1628 = vmatpush3.bf16.msra.mxu1 %v1756_v9 }
 0x3a9   : > { %1629 = vmatprep.subr.bf16.mxu1 %v2082_v0 }
 0x3ac   : > { %1630 = vmatpush3.bf16.msra.mxu1 %v1757_v10 }
 0x3ad   : > { %1631 = vmatprep.subr.bf16.mxu1 %v2082_v0 }
 0x3b0   : > { %1632 = vmatpush3.bf16.msra.mxu1 %v1758_v11 }
 0x3b1   : > { %1633 = vmatprep.subr.bf16.mxu1 %v2082_v0 }
 0x3b4   : > { %1634 = vmatpush3.bf16.msra.mxu1 %v1759_v12 }
 0x3b7   : > { %1636 = vmatmul.mubr.bf16.vlgmr.msra.gmra.mxu1 %v882_v62 }
 0x457   : > { %v1028_v13 = vpop.f32.mrf.mxu1 }
 0x458   : > { %v1029_v18 = vadd.f32 %v1482_v17, %v1028_v13 }
 0x459   : > { %v1617_v14 = vpop.f32.mrf.mxu1 }
 0x45a   : > { %v1040_v20 = vmul.f32 %v1484_v19, %v1029_v18 }
 0x45b   : > { %v1031_v15 = vpop.f32.mrf.mxu1 }
 0x45c   : > { %v1032_v21 = vadd.f32 %v1482_v17, %v1031_v15  ;;  %v1047_v23 = vadd.f32 %v1485_v22, %v1040_v20 }
 0x45d   : > { %v1618_v16 = vpop.f32.mrf.mxu1 }
 0x45e   : > { %v1041_v24 = vmul.f32 %v1484_v19, %v1032_v21  ;;  %v1049_v29 = vmax.f32 %v1047_v23, 0.0 }
 0x460   : > { %v1048_v27 = vadd.f32 %v1485_v22, %v1041_v24 }
 0x462   : > { %v1050_v32 = vmax.f32 %v1048_v27, 0.0 }
 0x477   : > { %v1154_v26 = vpop.f32.mrf.mxu1 }
 0x478   : > { %v1155_v28 = vadd.f32 %v1486_v25, %v1154_v26 }
 0x479   : > { %v1637_v0 = vpop.f32.mrf.mxu1 }
 0x47a   : > { %v1161_v30 = vadd.f32 %v1155_v28, %v1049_v29 }
 0x47b   : > { %v1157_v31 = vpop.f32.mrf.mxu1 }
 0x47c   : > { %v1158_v33 = vadd.f32 %v1486_v25, %v1157_v31  ;;  %v1163_v34 = vmax.f32 %v1161_v30, 0.0 }
 0x47d   : > { %v1638_v35 = vpop.f32.mrf.mxu1 }
 0x47e   : > { %v1162_v36 = vadd.f32 %v1158_v33, %v1050_v32  ;;  %v1165_v37 = vmul.f32 %v1163_v34, %v1163_v34 }
 0x480   : > { %v1164_v38 = vmax.f32 %v1162_v36, 0.0  ;;  %1167 = vadd.xlane.f32.xlu0 %v1165_v37 }
 0x482   : > { %v1166_v39 = vmul.f32 %v1164_v38, %v1164_v38 }
 0x484   : > { %1169 = vadd.xlane.f32.xlu0 %v1166_v39 }
 0x509   : > { %v1168_v40 = vpop.xlane.xlu0 %1167 }
 0x50a   : > { %v1171_v41 = vmax.f32 %v1168_v40, 1e-24 }
 0x50c   : > { %1760 = vrsqrt.f32 %v1171_v41 }
 0x50d   : > { %v1170_v42 = vpop.xlane.xlu0 %1169 }
 0x50e   : > { %v1172_v43 = vmax.f32 %v1170_v42, 1e-24 }
 0x510   : > { %1762 = vrsqrt.f32 %v1172_v43 }
 0x519   : > { %v1761_v44 = vpop.eup %1760 }
 0x51a   : > { %v1175_v45 = vmul.f32 %v1761_v44, %v1163_v34 }
 0x51c   : > { %1177 = vst [vmem:[%s588_s23] sm:$0xff] %v1175_v45 }
 0x51d   : > { %v1763_v46 = vpop.eup %1762 }
 0x51e   : > { %v1176_v47 = vmul.f32 %v1763_v46, %v1164_v38 }
 0x520   : > { %1178 = vst [vmem:[%s588_s23 + $0x8] sm:$0xff] %v1176_v47 }
 0x521   : > { %2001 = shalt.err (!%p1998_p2)
}
 0x522   : > { %s2002_s17 = scalar_lea.hbm %s2622_s0, 256  ;;  %s2006_s8 = scalar_lea.hbm %s2725_s12, 1024 }
 0x523   : > { %p2003_p10 = scmp.ne.s32.totalorder %s2622_s0, %s2002_s17  ;;  %p2007_p3 = scmp.lt.s32.totalorder %s2622_s0, %s2725_s12 }
 0x524   : > { %p2008_p11 = scmp.lt.s32.totalorder %s2006_s8, %s2002_s17 }
 0x525   : > { %p2004_p6 = pnand %p2003_p10, %p2726_p4 }
 0x526   : > { %p2009_p1 = por %p2008_p11, %p2007_p3 }
 0x527   : > { %p2005_p13 = pneg %p2004_p6 }
 0x529   : > { %p2010_p12 = pnand %p2009_p1, %p2005_p13 }
 0x52b   : > { %2013 = shalt.err (!%p2010_p12)
}
 0x52c   : > { %s2085_s22 = smov 128   ;;  %s2086_s27 = smov 8  }
 0x52d   : > { %1655 = dma.vmem_to_hbm [thread:$0]  (%p2726_p4), %s2624_s20, 256, %s2622_s0, %s1180_s2, %s2085_s22, %s2085_s22, %s2086_s27  }
 0x52e PF: > { %s2727_s19 = sld [smem:[#allocation23_spill]]  ;;  %p1687_p5 = scmp.ge.s32.totalorder %s2068_s30, 2 }
 0x52f   : > { %s2728_s3 = sld [smem:[#allocation27_spill]] }
 0x534   : > { %s1208_s29 = sand.u32 1, %s2727_s19  }
 0x535   : > { %p2729_p7 = scmp.ne.s32.totalorder %s2728_s3, 0  ;;  %s1209_s25 = scalar_lea.sflag [#allocation4], %s1208_s29 }
 0x537   : > { %p1683_p8 = pnand %p1687_p5, %p2729_p7 }
 0x539   : > { %p1684_p9 = pneg %p1683_p8 }
 0x53b   : > { %2051 = dma.done.wait (%p1684_p9), %s1209_s25, 256  }
 0x53c   : > { %2053 = vsyncadd (%p1684_p9), %s1209_s25, 4294967040  ;;  %s2730_s30 = sld [smem:[#allocation25_spill]]  ;;  %s2733_s27 = smov %s2060_s28 }
 0x53d   : > { %s2731_s15 = sld [smem:[#allocation24_spill]] }
 0x53e   : > { %s2732_s29 = sld [smem:[#allocation26_spill]] }
 0x542   : > { %p33_p0 = scmp.ge.s32.totalorder %s2730_s30, 6  }
 0x543   : > { %s2734_s28 = smov %s2731_s15 }
 0x544   :  { %35 = sbr.rel (!%p33_p0) target bundleno = 20 (0x14), region = 182 }
 0x549   :  { %1214 = vsyncpa [#allocation3], 1 }
 0x54a   :  { %1216 = vsyncpa [#allocation3 + $0x1], 1 }
 0x54b   :  { %1217 = vsyncpa [#allocation6], 1 }
 0x54c   :  { %1219 = vsyncpa [#allocation6 + $0x1], 1 }
 0x54d   :  { %1220 = vsyncpa [#allocation9], 1 }
 0x54e   :  { %1222 = vsyncpa [#allocation9 + $0x1], 1 }
 0x54f   :  { %1223 = vsyncpa [#allocation12], 1 }
 0x550   :  { %1225 = vsyncpa [#allocation12 + $0x1], 1 }
 0x551   :  { %1226 = vsyncpa [#allocation15], 1 }
 0x552   :  { %1228 = vsyncpa [#allocation15 + $0x1], 1 }
 0x553   :  { %1229 = vsyncpa [#allocation4], 1 }
 0x554   :  { %1231 = vsyncpa [#allocation4 + $0x1], 1 }

</bundles_post_ra>
